<compile_context>
chip_gen: v6e
topology: v6e:2x2x1
jax: 0.10.0
libtpu: 0.0.40
codegen_flags: <defaults>
</compile_context>

<pallas_src>
import jax
import jax.numpy as jnp
from jax.experimental import pallas as pl
from jax.experimental.pallas import tpu as pltpu


def _round_up(x, m):
    return (x + m - 1) // m * m


def _cdiv(a, b):
    return (a + b - 1) // b


# ---------------------------------------------------------------------------
# Kernel: one (tile_m x tile_n) tile of logits = nan_to_num(x @ W_out + b_out)
# ---------------------------------------------------------------------------
def _wyckoff_kernel(x_ref, w_ref, b_ref, o_ref):
    # MXU matmul: bf16 operands, f32 accumulation.
    logits = jnp.dot(x_ref[...], w_ref[...],
                     preferred_element_type=jnp.float32)        # (tile_m, tile_n)
    logits = logits + b_ref[...]                                # f32 bias add (VPU)
    # torch.nan_to_num epilogue (applied unconditionally; identical result to
    # the torch `if isnan(...).any()` guard).
    o_ref[...] = jnp.nan_to_num(logits).astype(o_ref.dtype)


# ---------------------------------------------------------------------------
# One-time parameter preparation (pad + cast hoisted out of the forward path)
# ---------------------------------------------------------------------------
def prepare_wyckoff_params(params, compute_dtype=jnp.bfloat16):
    """Pad / cast the output-projection weights once; reuse across calls."""
    D, V = params["w_out"].shape
    Dp = _round_up(D, 128)
    Vp = _round_up(V, 128)
    w_out_p = jnp.pad(params["w_out"],
                      ((0, Dp - D), (0, Vp - V))).astype(compute_dtype)   # (Dp, Vp)
    b_out_p = jnp.pad(params["b_out"],
                      (0, Vp - V)).astype(jnp.float32).reshape(1, Vp)     # (1, Vp)
    prepared = {
        "w_out_p": w_out_p,
        "b_out_p": b_out_p,
        "d_model": D,
        "vocab_size": V,
    }
    if "w_sg" in params:
        prepared["w_sg"] = params["w_sg"].astype(jnp.float32)
        prepared["b_sg"] = params["b_sg"].astype(jnp.float32)
    return prepared


# ---------------------------------------------------------------------------
# Forward wrapper
# ---------------------------------------------------------------------------
def wyckoff_decoder_forward(hidden_states, spacegroup_ctx, prepared,
                            *, compute_dtype=jnp.bfloat16,
                            out_dtype=jnp.float32):
    """Pallas implementation of WyckoffDecoder.forward (condition_on=['sg']).

    Args:
      hidden_states:  (B, L, D) float32 atom embeddings
      spacegroup_ctx: (B, 1, D) or (B, D) float32, or None (unconditioned)
      prepared:       output of prepare_wyckoff_params (+ optional w_sg/b_sg)
      out_dtype:      logits dtype (bf16 halves the dominant HBM store traffic)
    Returns:
      {'wyckoff_logits': (B, L, V) array of out_dtype}
    """
    B, L, D = hidden_states.shape
    V = prepared["vocab_size"]
    w_p = prepared["w_out_p"]                # (Dp, Vp) bf16
    b_p = prepared["b_out_p"]                # (1, Vp)  f32
    Dp, Vp = w_p.shape

    # --- sg conditioning hoisted out of the per-token path ------------------
    x = hidden_states.astype(jnp.float32)
    if spacegroup_ctx is not None and "w_sg" in prepared:
        sg = spacegroup_ctx
        if sg.ndim == 3:
            sg = sg[:, 0, :]                                     # (B, D)
        sg_inf = sg.astype(jnp.float32) @ prepared["w_sg"] + prepared["b_sg"]
        x = x + sg_inf[:, None, :]                               # f32 residual
    # else: PyTorch skips sg_conditioning entirely -> no residual at all.

    # --- flatten (B, L) -> M, cast to bf16, pad to MXU/lane-friendly shapes -
    M = B * L
    x2 = x.reshape(M, D).astype(compute_dtype)                   # (M, D) bf16

    # vocab tiling: single full-width tile when small (W_out read once),
    # otherwise the largest 128-multiple divisor of Vp <= 512 (no extra pad).
    if Vp <= 512:
        tile_n = Vp
    else:
        tile_n = max(t for t in (512, 384, 256, 128) if Vp % t == 0)
    grid_v = Vp // tile_n

    # M tiling: minimize padding (round to 8), cap tile at 512 rows, and keep
    # at least 2 parallel grid points when possible so v7x's 2 TCs both work.
    Mp8 = _round_up(max(M, 1), 8)
    n_m = _cdiv(Mp8, 512)
    if grid_v == 1 and n_m == 1 and Mp8 >= 16:
        n_m = 2
    tile_m = _round_up(_cdiv(Mp8, n_m), 8)
    Mp = n_m * tile_m
    grid_m = n_m

    x_pad = jnp.pad(x2, ((0, Mp - M), (0, Dp - D)))              # (Mp, Dp) bf16

    # Grid: (vocab tiles, M tiles); M innermost so the current W_out / bias
    # tile stays VMEM-resident across the full M sweep.  Both axes parallel.
    grid = (grid_v, grid_m)

    logits_p = pl.pallas_call(
        _wyckoff_kernel,
        out_shape=jax.ShapeDtypeStruct((Mp, Vp), out_dtype),
        grid_spec=pltpu.PrefetchScalarGridSpec(
            num_scalar_prefetch=0,
            grid=grid,
            in_specs=[
                pl.BlockSpec((tile_m, Dp), lambda v, m: (m, 0)),   # activations
                pl.BlockSpec((Dp, tile_n), lambda v, m: (0, v)),   # W_out tile
                pl.BlockSpec((1, tile_n),  lambda v, m: (0, v)),   # b_out tile
            ],
            out_specs=pl.BlockSpec((tile_m, tile_n), lambda v, m: (m, v)),
        ),
        compiler_params=pltpu.CompilerParams(
            dimension_semantics=("parallel", "parallel"),
            vmem_limit_bytes=48 * 1024 * 1024),
    )(x_pad, w_p, b_p)

    # TODO(synk): optionally fuse the downstream log-softmax / top-k into the
    # kernel epilogue to avoid materializing (B, L, V) logits at all.
    logits = logits_p[:M, :V].reshape(B, L, V)
    return {"wyckoff_logits": logits}


# ---------------------------------------------------------------------------
# Test harness
# ---------------------------------------------------------------------------
def _init_params(key, d_model, vocab_size):
    k1, k2, k3, k4 = jax.random.split(key, 4)
    scale = 1.0 / jnp.sqrt(d_model)
    return {
        # stored pre-transposed as (in, out) relative to torch's (out, in)
        "w_sg": jax.random.uniform(k1, (d_model, d_model), jnp.float32,
                                   -scale, scale),
        "b_sg": jax.random.uniform(k2, (d_model,), jnp.float32, -scale, scale),
        "w_out": jax.random.uniform(k3, (d_model, vocab_size), jnp.float32,
                                    -scale, scale),
        "b_out": jax.random.uniform(k4, (vocab_size,), jnp.float32,
                                    -scale, scale),
    }


def _reference(hidden_states, spacegroup_ctx, params,
               compute_dtype=jnp.bfloat16):
    """Pure-JAX reference using the same bf16-operand / f32-accumulate math."""
    if spacegroup_ctx is not None:
        sg = spacegroup_ctx
        if sg.ndim == 3:
            sg = sg[:, 0, :]
        sg_inf = sg @ params["w_sg"] + params["b_sg"]            # (B, D)
        h = hidden_states + sg_inf[:, None, :]
    else:
        h = hidden_states
    logits = jnp.einsum("bld,dv->blv",
                        h.astype(compute_dtype),
                        params["w_out"].astype(compute_dtype),
                        preferred_element_type=jnp.float32) + params["b_out"]
    return jnp.nan_to_num(logits)


if __name__ == "__main__":
    B, L, D, V = 2, 8, 32, 24   # small shapes; vocab_size chosen synthetically

    key = jax.random.PRNGKey(0)
    k_h, k_sg, k_p = jax.random.split(key, 3)

    hidden_states = jax.random.normal(k_h, (B, L, D), jnp.float32)
    spacegroup_ctx = jax.random.normal(k_sg, (B, 1, D), jnp.float32)
    params = _init_params(k_p, D, V)

    # One-time weight pad/cast (hoisted out of the per-call path).
    prepared = prepare_wyckoff_params(params)

    out = wyckoff_decoder_forward(hidden_states, spacegroup_ctx, prepared)
    logits = jax.block_until_ready(out["wyckoff_logits"])

    ref = _reference(hidden_states, spacegroup_ctx, params)
    assert logits.shape == (B, L, V), logits.shape
    assert jnp.allclose(logits, ref, atol=2e-3, rtol=2e-3), "mismatch vs ref"

    # also exercise the unconditioned path (spacegroup ctx absent)
    out_nc = wyckoff_decoder_forward(hidden_states, None, prepared)
    logits_nc = jax.block_until_ready(out_nc["wyckoff_logits"])
    ref_nc = _reference(hidden_states, None, params)
    assert jnp.allclose(logits_nc, ref_nc, atol=2e-3, rtol=2e-3), "mismatch (no sg)"

    print("KERNEL_OK")
</pallas_src>

<mosaic_0001>
module attributes {stable_mosaic.version = 11 : i64} {
  func.func @_wyckoff_kernel(%arg0: i32, %arg1: i32, %arg2: memref<8x128xbf16, #tpu.memory_space<vmem>>, %arg3: memref<128x128xbf16, #tpu.memory_space<vmem>>, %arg4: memref<1x128xf32, #tpu.memory_space<vmem>>, %arg5: memref<8x128xf32, #tpu.memory_space<vmem>>) attributes {dimension_semantics = [#tpu.dimension_semantics<parallel>, #tpu.dimension_semantics<parallel>], iteration_bounds = array<i64: 1, 2>, scalar_prefetch = 0 : i64, scratch_operands = 0 : i64, tpu.core_type = #tpu.core_type<tc>, window_params = [{transform_indices = @transform_0, window_bounds = array<i64: 8, 128>}, {transform_indices = @transform_1, window_bounds = array<i64: 128, 128>}, {transform_indices = @transform_2, window_bounds = array<i64: 1, 128>}, {transform_indices = @transform_3, window_bounds = array<i64: 8, 128>}]} {
    %c0 = arith.constant 0 : index
    %c0_0 = arith.constant 0 : index
    %0 = vector.load %arg2[%c0, %c0_0] : memref<8x128xbf16, #tpu.memory_space<vmem>>, vector<8x128xbf16>
    %c0_1 = arith.constant 0 : index
    %c0_2 = arith.constant 0 : index
    %1 = vector.load %arg3[%c0_1, %c0_2] : memref<128x128xbf16, #tpu.memory_space<vmem>>, vector<128x128xbf16>
    %cst = arith.constant dense<0.000000e+00> : vector<8x128xf32>
    %2 = tpu.matmul %0, %1, %cst {dimension_numbers = #tpu.dot_dimension_numbers<[1], [0], [0], [1], [0, 0, 1, 1], [], []>} : vector<8x128xbf16>, vector<128x128xbf16>, vector<8x128xf32> -> vector<8x128xf32>
    %c0_3 = arith.constant 0 : index
    %c0_4 = arith.constant 0 : index
    %3 = vector.load %arg4[%c0_3, %c0_4] : memref<1x128xf32, #tpu.memory_space<vmem>>, vector<1x128xf32>
    %4 = vector.broadcast %3 : vector<1x128xf32> to vector<8x128xf32>
    %5 = arith.addf %2, %4 : vector<8x128xf32>
    %6 = arith.cmpf one, %5, %5 : vector<8x128xf32>
    %cst_5 = arith.constant 0.000000e+00 : f32
    %7 = vector.broadcast %cst_5 : f32 to vector<8x128xf32>
    %8 = arith.select %6, %7, %5 : vector<8x128xi1>, vector<8x128xf32>
    %cst_6 = arith.constant 0x7F800000 : f32
    %9 = vector.broadcast %cst_6 : f32 to vector<8x128xf32>
    %10 = arith.cmpf oeq, %8, %9 : vector<8x128xf32>
    %cst_7 = arith.constant 3.40282347E+38 : f32
    %11 = vector.broadcast %cst_7 : f32 to vector<8x128xf32>
    %12 = arith.select %10, %11, %8 : vector<8x128xi1>, vector<8x128xf32>
    %cst_8 = arith.constant 0xFF800000 : f32
    %13 = vector.broadcast %cst_8 : f32 to vector<8x128xf32>
    %14 = arith.cmpf oeq, %12, %13 : vector<8x128xf32>
    %cst_9 = arith.constant -3.40282347E+38 : f32
    %15 = vector.broadcast %cst_9 : f32 to vector<8x128xf32>
    %16 = arith.select %14, %15, %12 : vector<8x128xi1>, vector<8x128xf32>
    %c0_10 = arith.constant 0 : index
    %c0_11 = arith.constant 0 : index
    %17 = vector.load %arg5[%c0_10, %c0_11] : memref<8x128xf32, #tpu.memory_space<vmem>>, vector<8x128xf32>
    tpu.vector_store %arg5[%c0_10, %c0_11], %16 {strides = array<i32>} : memref<8x128xf32, #tpu.memory_space<vmem>>, vector<8x128xf32>,
    return
  }
  func.func @transform_0(%arg0: i32, %arg1: i32) -> (i32, i32) {
    %c0_i32 = arith.constant 0 : i32
    %c0_i32_0 = arith.constant 0 : i32
    return %arg1, %c0_i32 : i32, i32
  }
  func.func @transform_1(%arg0: i32, %arg1: i32) -> (i32, i32) {
    %c0_i32 = arith.constant 0 : i32
    %c0_i32_0 = arith.constant 0 : i32
    return %c0_i32, %arg0 : i32, i32
  }
  func.func @transform_2(%arg0: i32, %arg1: i32) -> (i32, i32) {
    %c0_i32 = arith.constant 0 : i32
    %c0_i32_0 = arith.constant 0 : i32
    return %c0_i32, %arg0 : i32, i32
  }
  func.func @transform_3(%arg0: i32, %arg1: i32) -> (i32, i32) {
    %c0_i32 = arith.constant 0 : i32
    return %arg1, %arg0 : i32, i32
  }
}

</mosaic_0001>

<bundles_post_ra>
// kernel: tpu_custom_call.1
= control target key start
LH: loop header
LB: loop body
LE: loop exit
PB: predicated region body
PF: predicated region fallthrough
CT: control target
= control target key end

     0   :  { %8 = vsyncpa [#allocation3], 0  ;;  %s960_s0 = inlined_call_operand.hbm [shape: bf16[16,128], index: 0, kind: input, shape index: {}]   ;;  %s961_s1 = inlined_call_operand.hbm [shape: bf16[128,128], index: 1, kind: input, shape index: {}]   ;;  %s962_s2 = inlined_call_operand.vmem [shape: f32[1,128], index: 2, kind: input, shape index: {}]   ;;  %s963_s3 = inlined_call_operand.hbm [shape: f32[16,128], index: 3, kind: output, shape index: {}]  }
   0x1   :  { %10 = vsyncpa [#allocation3 + $0x1], 0 }
   0x2   :  { %11 = vsyncpa [#allocation6], 0 }
   0x3   :  { %12 = vsyncpa [#allocation4], 0 }
   0x4   :  { %14 = vsyncpa [#allocation4 + $0x1], 0  ;;  %s780_s12 = smov 0   ;;  %s782_s13 = smov 0  }
   0x5   :  { %s784_s14 = smov 0   ;;  %s786_s15 = smov 0  }
   0x6   :  { %s788_s16 = smov 0   ;;  %s790_s17 = smov 0  }
   0x7 LB: > { %s474_s18 = sadd.s32 4294967295, %s751_s17   ;;  %s475_s19 = sadd.s32 4294967294, %s751_s17   ;;  %s751_s17 = sphi %s790_s17, %s20_s17   ;;  %s747_s16 = sphi %s788_s16, %s981_s16   ;;  %s743_s15 = sphi %s786_s15, %s980_s15   ;;  %s739_s14 = sphi %s784_s14, %s979_s14   ;;  %s735_s13 = sphi %s782_s13, %s978_s13   ;;  %s731_s12 = sphi %s780_s12, %s977_s12  }
   0x8   : > { %p52_p0 = scmp.ne.s32.totalorder %s735_s13, %s731_s12  ;;  %p814_p1 = scmp.eq.s32.totalorder %s474_s18, 0 }
   0x9   : > { %p818_p2 = scmp.eq.s32.totalorder %s474_s18, 1  ;;  %p136_p3 = scmp.eq.s32.totalorder %s475_s19, 1 }
   0xa   : > { %p824_p4 = por %p814_p1, %p52_p0  ;;  %p476_p5 = scmp.ge.s32.totalorder %s751_s17, 1 }
   0xb   : > { %p829_p6 = por %p136_p3, %p52_p0  ;;  %p143_p7 = scmp.lt.s32.totalorder %s751_s17, 3 }
   0xc   : > { %s967_s22 = scalar_select %p824_p4, 1, 0 }
   0xd   : > { %s968_s23 = scalar_select %p829_p6, 1, 0 }
   0xe   : > { %p834_p8 = pnand %p476_p5, %p143_p7  ;;  %s753_s25 = smov [#allocation5]  }
   0xf   : > { %s157_s26 = sshll.u32 %s753_s25, 4  ;;  %s29_s28 = sadd.s32 1, %s747_s16  ;;  %s158_s26 = int_to_ptr.vmem [resolvable:$true] %s157_s26 }
  0x10   : > { %p536_p9 = pneg %p834_p8  ;;  %s624_s29 = scalar_lea.vmem %s158_s26, 1024 }
  0x11   : > { %p625_p13 = scmp.ne.s32.totalorder %s158_s26, %s624_s29  ;;  %p632_p5 = scmp.lt.s32.totalorder %s158_s26, %s158_s26 }
  0x12   : > { %p843_p11 = pnand %p536_p9, %p814_p1  ;;  %p633_p7 = scmp.lt.s32.totalorder %s624_s29, %s624_s29 }
  0x14   : > { %p615_p12 = pneg %p843_p11  ;;  %p634_p6 = por %p633_p7, %p632_p5 }
  0x16   : > { %p627_p0 = pnand %p625_p13, %p615_p12 }
  0x18   : > { %p628_p3 = pneg %p627_p0 }
  0x1a   : > { %p635_p4 = pnand %p634_p6, %p628_p3 }
  0x1c   : > { %638 = shalt.err (!%p635_p4)
}
  0x1d   : > { %s754_s30 = smov 64   ;;  %s755_s4 = smov 4  }
  0x1e   : > { %539 = dma.hbm_to_vmem [thread:$0]  (!%p843_p11), %s961_s1, 1024, %s158_s26, [#allocation6], %s754_s30, %s754_s30, %s755_s4  }
  0x1f   : > { %p30_p6 = scmp.ge.s32.totalorder %s29_s28, 2  ;;  %s39_s7 = sadd.s32 1, %s739_s14 }
  0x20   : > { %p46_p4 = scmp.ne.s32.totalorder %s739_s14, %s735_s13  ;;  %p47_p9 = scmp.eq.s32.totalorder %s751_s17, 0 }
  0x21   : > { %s983_s28 = smov (%p30_p6, %s29_s28), 0  ;;  %p549_p0 = scmp.lt.s32.totalorder %s751_s17, 2 }
  0x22   : > { %p861_p12 = por %p47_p9, %p46_p4  ;;  %p867_p13 = por %p818_p2, %p46_p4 }
  0x23   : > { %s36_s10 = ssub.s32 %s747_s16, %s983_s28  ;;  %s177_s11 = sand.u32 1, %s739_s14  }
  0x24   : > { %p37_p11 = scmp.eq.s32.totalorder %s36_s10, 0  ;;  %s480_s18 = sshll.u32 %s177_s11, 2 }
  0x25   : > { %s481_s25 = sshll.u32 %s747_s16, 6  ;;  %s181_s30 = scalar_lea.vmem [#allocation2], %s480_s18 }
  0x26   : > { %s876_s19 = scalar_select %p37_p11, %s739_s14, %s39_s7  }
  0x27   : > { %s186_s29 = scalar_lea.hbm %s960_s0, %s481_s25  ;;  %s188_s4 = sshll.u32 %s181_s30, 4  ;;  %s189_s4 = int_to_ptr.vmem [resolvable:$true] %s188_s4 }
  0x28   : > { %p884_p2 = pnand %p549_p0, %p861_p12  ;;  %s178_s5 = scalar_lea.sflag [#allocation3], %s177_s11 }
  0x29   : > { %s652_s6 = scalar_lea.vmem %s189_s4, 64  ;;  %s756_s7 = smov [#allocation2]  }
  0x2a   : > { %p641_p3 = pneg %p884_p2  ;;  %p653_p5 = scmp.ne.s32.totalorder %s189_s4, %s652_s6 }
  0x2b   : > { %s657_s10 = sshll.u32 %s756_s7, 4  ;;  %s658_s10 = int_to_ptr.vmem [resolvable:$false] %s657_s10 }
  0x2c   : > { %p655_p7 = pnand %p653_p5, %p641_p3  ;;  %s659_s25 = scalar_lea.vmem %s658_s10, 128 }
  0x2d   : > { %p660_p4 = scmp.lt.s32.totalorder %s189_s4, %s658_s10  ;;  %p661_p9 = scmp.lt.s32.totalorder %s659_s25, %s652_s6 }
  0x2e   : > { %p656_p6 = pneg %p655_p7 }
  0x2f   : > { %p662_p11 = por %p661_p9, %p660_p4 }
  0x31   : > { %p663_p10 = pnand %p662_p11, %p656_p6 }
  0x33   : > { %666 = shalt.err (!%p663_p10)
}
  0x34   : > { %543 = dma.hbm_to_vmem [thread:$0]  (!%p884_p2), %s186_s29, 64, %s189_s4, %s178_s5  }
  0x35   : > { %197 = sbr.rel (%p834_p8) target bundleno = 308 (0x134), region = 32  ;;  %s895_s8 = sand.u32 (!%p834_p8), 1, %s735_s13  }
  0x36   : > { %s483_s11 = sshll.u32 (!%p834_p8), %s895_s8, 2  ;;  %s200_s18 = scalar_lea.sflag (!%p834_p8), [#allocation3], %s895_s8 }
  0x37   : > { %s899_s26 = scalar_lea.vmem (!%p834_p8), [#allocation2], %s483_s11  ;;  %p974_p12 = scmp.ne.s32.totalorder (!%p834_p8), %s967_s22, 0 }
  0x3a   : > { %718 = dma.done.wait (%p974_p12), %s200_s18, 64  }
  0x3b   : > { %720 = vsyncadd (%p974_p12), %s200_s18, 4294967232 }
  0x3c   : > { %722 = dma.done.wait (%p814_p1), [#allocation6], 1024  }
  0x3d   : > { %724 = vsyncadd (%p814_p1), [#allocation6], 4294966272  ;;  %v757_v0 = vmov 0.0   ;;  %vm758_vm0 = vmmov 0   ;;  %v605_v1 = vld [vmem:[#allocation5 + $0x38] sm:$0xff]   ;;  %v606_v2 = vld [vmem:[#allocation5 + $0x30] sm:$0xff]  }
  0x3e   : > { %508 = vmatprep.subr.bf16.mxu0 %v757_v0  ;;  %524 = vmatprep.mubr.msk.bf16.mxu0 %vm758_vm0, %v757_v0  ;;  %v607_v3 = vld [vmem:[#allocation5 + $0x28] sm:$0xff]   ;;  %v608_v4 = vld [vmem:[#allocation5 + $0x20] sm:$0xff]   ;;  %v609_v5 = vld [vmem:[#allocation5 + $0x18] sm:$0xff]   ;;  %s485_s24 = sshll.u32 %s895_s8, 3  ;;  %s496_s27 = sshll.u32 %s743_s15, 7 }
  0x3f   : > { %509 = vmatpush3.bf16.msra.mxu0 %v605_v1  ;;  %v610_v6 = vld [vmem:[#allocation5 + $0x10] sm:$0xff]   ;;  %v611_v7 = vld [vmem:[#allocation5 + $0x8] sm:$0xff]   ;;  %v612_v8 = vld [vmem:[#allocation5] sm:$0xff]   ;;  %s232_s29 = scalar_lea.vmem [#allocation7], %s485_s24  ;;  %s918_s5 = scalar_lea.hbm %s963_s3, %s496_s27 }
  0x40   : > { %510 = vmatprep.subr.bf16.mxu0 %v757_v0  ;;  %v237_v9 = vld [vmem:[%s899_s26] sm:$0xf]  ;;  %s371_s30 = sshll.u32 %s232_s29, 4  ;;  %s357_s6 = scalar_lea.sflag [#allocation4], %s895_s8  ;;  %s372_s30 = int_to_ptr.vmem [resolvable:$true] %s371_s30 }
  0x41   : > { %v486_v10 = vld [vmem:[%s962_s2] ss:$0 sm:$0xff]  ;;  %s667_s7 = scalar_lea.vmem %s372_s30, 128  ;;  %s759_s15 = smov [#allocation7]  }
  0x42   : > { %p668_p1 = scmp.ne.s32.totalorder %s372_s30, %s667_s7  ;;  %s671_s10 = sshll.u32 %s759_s15, 4  ;;  %s672_s10 = int_to_ptr.vmem [resolvable:$false] %s671_s10 }
  0x43   : > { %511 = vmatpush3.bf16.msra.mxu0 %v606_v2  ;;  %s673_s25 = scalar_lea.vmem %s672_s10, 256  ;;  %p674_p0 = scmp.lt.s32.totalorder %s372_s30, %s672_s10 }
  0x44   : > { %512 = vmatprep.subr.bf16.mxu0 %v757_v0  ;;  %p669_p8 = pnand %p668_p1, %p867_p13  ;;  %p675_p2 = scmp.lt.s32.totalorder %s673_s25, %s667_s7 }
  0x46   : > { %p670_p10 = pneg %p669_p8  ;;  %p676_p3 = por %p675_p2, %p674_p0 }
  0x47   : > { %513 = vmatpush3.bf16.msra.mxu0 %v607_v3 }
  0x48   : > { %514 = vmatprep.subr.bf16.mxu0 %v757_v0  ;;  %p677_p5 = pnand %p676_p3, %p670_p10 }
  0x4b   : > { %515 = vmatpush3.bf16.msra.mxu0 %v608_v4 }
  0x4c   : > { %516 = vmatprep.subr.bf16.mxu0 %v757_v0 }
  0x4f   : > { %517 = vmatpush3.bf16.msra.mxu0 %v609_v5 }
  0x50   : > { %518 = vmatprep.subr.bf16.mxu0 %v757_v0 }
  0x53   : > { %519 = vmatpush3.bf16.msra.mxu0 %v610_v6 }
  0x54   : > { %520 = vmatprep.subr.bf16.mxu0 %v757_v0 }
  0x57   : > { %521 = vmatpush3.bf16.msra.mxu0 %v611_v7 }
  0x58   : > { %522 = vmatprep.subr.bf16.mxu0 %v757_v0 }
  0x5b   : > { %523 = vmatpush3.bf16.msra.mxu0 %v612_v8 }
  0x5e   : > { %525 = vmatmul.mubr.bf16.vlgmr.msra.gmra.mxu0 %v237_v9 }
 0x11e   : > { %v343_v11 = vpop.f32.mrf.mxu0 }
 0x11f   : > { %v344_v12 = vadd.f32 %v486_v10, %v343_v11 }
 0x120   : > { %v526_v13 = vpop.f32.mrf.mxu0 }
 0x121   : > { %vm349_vm1 = vcmp.ne.f32.partialorder %v344_v12, %v344_v12 }
 0x122   : > { %v350_v14 = vsel %vm349_vm1, 0.0, %v344_v12  ;;  %v346_v15 = vpop.f32.mrf.mxu0 }
 0x123   : > { %vm351_vm2 = vcmp.eq.f32.partialorder %v350_v14, inf }
 0x124   : > { %v352_v16 = vsel %vm351_vm2, 3.4028235e+38, %v350_v14  ;;  %v527_v17 = vpop.f32.mrf.mxu0 }
 0x125   : > { %vm353_vm3 = vcmp.eq.f32.partialorder %v352_v16, -inf }
 0x126   : > { %v354_v18 = vsel %vm353_vm3, -3.4028235e+38, %v352_v16 }
 0x127   : > { %355 = vst [vmem:[%s232_s29] sm:$0xff] %v354_v18 }
 0x128   : > { %680 = shalt.err (!%p677_p5)
}
 0x129   : > { %s681_s11 = scalar_lea.hbm %s918_s5, 128  ;;  %s685_s26 = scalar_lea.hbm %s963_s3, 256 }
 0x12a   : > { %p682_p7 = scmp.ne.s32.totalorder %s918_s5, %s681_s11  ;;  %p686_p9 = scmp.lt.s32.totalorder %s918_s5, %s963_s3 }
 0x12b   : > { %p687_p11 = scmp.lt.s32.totalorder %s685_s26, %s681_s11 }
 0x12c   : > { %p683_p6 = pnand %p682_p7, %p867_p13 }
 0x12d   : > { %p688_p12 = por %p687_p11, %p686_p9 }
 0x12e   : > { %p684_p4 = pneg %p683_p6 }
 0x130   : > { %p689_p1 = pnand %p688_p12, %p684_p4 }
 0x132   : > { %692 = shalt.err (!%p689_p1)
}
 0x133   : > { %534 = dma.vmem_to_hbm [thread:$0]  (%p867_p13), %s372_s30, 128, %s918_s5, %s357_s6  }
 0x134 PF: > { %s383_s24 = sand.u32 1, %s731_s12   ;;  %p975_p8 = scmp.ne.s32.totalorder %s968_s23, 0 }
 0x135   : > { %p976_p10 = scmp.ge.s32.totalorder %s751_s17, 2  ;;  %s384_s27 = scalar_lea.sflag [#allocation4], %s383_s24 }
 0x137   : > { %p545_p0 = pnand %p976_p10, %p975_p8 }
 0x139   : > { %p546_p2 = pneg %p545_p0 }
 0x13b   : > { %726 = dma.done.wait (%p546_p2), %s384_s27, 128  }
 0x13c   : > { %728 = vsyncadd (%p546_p2), %s384_s27, 4294967168  ;;  %s20_s17 = sadd.s32 1, %s751_s17   ;;  %s977_s12 = smov %s735_s13 }
 0x13d   : > { %p17_p3 = scmp.ge.s32.totalorder %s20_s17, 4   ;;  %s978_s13 = smov %s739_s14 }
 0x13e   : > { %s979_s14 = smov %s876_s19  ;;  %s980_s15 = smov %s747_s16 }
 0x13f   : > { %s981_s16 = smov %s983_s28  ;;  %19 = sbr.rel (!%p17_p3) target bundleno = 7 (0x7), region = 85 }
 0x144   :  { %389 = vsyncpa [#allocation3], 1 }
 0x145   :  { %391 = vsyncpa [#allocation3 + $0x1], 1 }
 0x146   :  { %392 = vsyncpa [#allocation6], 1 }
 0x147   :  { %393 = vsyncpa [#allocation4], 1 }
 0x148   :  { %395 = vsyncpa [#allocation4 + $0x1], 1 }

</bundles_post_ra>
